<compile_context>
chip_gen: v7x
topology: tpu7x:2x2x1
jax: 0.10.0
libtpu: 0.0.40
codegen_flags: <defaults>
</compile_context>

<pallas_src>
import functools

import jax
import jax.numpy as jnp
from jax.experimental import pallas as pl
from jax.experimental.pallas import tpu as pltpu

ALPHA = 0.05          # module default __init__ arg
LANES = 128
SUBLANES = 8
TARGET_ROW_TILE = 2048   # (2048, 128) f32 = 1 MiB per input block
NUM_CORE_SLICES = 2      # leading "parallel" axis -> both TCs on v7x


def _bce_blur_kernel(pred_ref, true_ref, out_ref, acc_ref, *,
                     alpha, total, bps, row_tile, needs_mask):
    c = pl.program_id(0)   # core slice ("parallel")
    i = pl.program_id(1)   # reduction step within the slice ("arbitrary")

    @pl.when(i == 0)
    def _init():
        acc_ref[...] = jnp.zeros_like(acc_ref)

    x = pred_ref[...].astype(jnp.float32)
    y = true_ref[...].astype(jnp.float32)

    # One exp per element, reused for both the stable BCE log-term and the sigmoid.
    e = jnp.exp(-jnp.abs(x))                                 # EUP
    bce = jnp.maximum(x, 0.0) - x * y + jnp.log1p(e)         # BCE-with-logits (stable)
    inv = 1.0 / (1.0 + e)                                    # sigmoid(|x|)
    p = jnp.where(x >= 0.0, inv, e * inv)                    # sigmoid(x)
    af = 1.0 - jnp.exp((p - y - 1.0) / (alpha + 1e-4))
    loss = bce * af

    if needs_mask:
        # Zero out padded / out-of-bounds / duplicated elements via global flat index.
        logical_block = c * bps + i
        row0 = logical_block * row_tile
        r_idx = jax.lax.broadcasted_iota(jnp.int32, loss.shape, 0)
        l_idx = jax.lax.broadcasted_iota(jnp.int32, loss.shape, 1)
        gidx = (row0 + r_idx) * LANES + l_idx
        loss = jnp.where(gidx < total, loss, 0.0)

    # VPU-only accumulation into a vreg-shaped accumulator (no per-step XLU reduce).
    acc_ref[...] += loss.reshape(row_tile // SUBLANES, SUBLANES, LANES).sum(axis=0)

    @pl.when(i == pl.num_programs(1) - 1)
    def _finalize():
        # One sublane reduce per slice; per-lane partial sums go to the output row.
        out_ref[...] = jnp.sum(acc_ref[...], axis=0, keepdims=True)


def bce_blur_with_logits_loss(pred, true, alpha=ALPHA):
    """Pallas implementation of BCEBlurWithLogitsLoss.forward. Returns a scalar."""
    assert pred.shape == true.shape, "pred/true shape mismatch"
    total = pred.size
    p_flat = pred.reshape(-1)
    t_flat = true.reshape(-1)

    # Pad (only when necessary) so the flat length is a multiple of 8*128; padded
    # elements are masked out in-kernel and the mean divides by the true N.
    chunk = SUBLANES * LANES
    padded = pl.cdiv(total, chunk) * chunk
    if padded != total:
        # TODO(synk): tail pad materializes a copy; a ragged-tail DMA would avoid it.
        p_flat = jnp.pad(p_flat, (0, padded - total))
        t_flat = jnp.pad(t_flat, (0, padded - total))

    rows = padded // LANES                     # multiple of 8
    row_tile = min(TARGET_ROW_TILE, rows)      # multiple of 8, <= rows
    nblocks = pl.cdiv(rows, row_tile)
    num_slices = NUM_CORE_SLICES if nblocks >= NUM_CORE_SLICES else 1
    bps = pl.cdiv(nblocks, num_slices)         # reduction steps per slice

    p2d = p_flat.reshape(rows, LANES)          # native dtype; cast happens in-kernel
    t2d = t_flat.reshape(rows, LANES)

    needs_mask = (padded != total) or (rows % row_tile != 0) \
        or (num_slices * bps != nblocks)

    def in_map(c, i):
        # Clamp so a fully out-of-range grid step re-reads the last valid block;
        # its contribution is zeroed by the in-kernel mask.
        return (jnp.minimum(c * bps + i, nblocks - 1), 0)

    kernel = functools.partial(
        _bce_blur_kernel, alpha=alpha, total=total, bps=bps,
        row_tile=row_tile, needs_mask=needs_mask)

    partials = pl.pallas_call(
        kernel,
        out_shape=jax.ShapeDtypeStruct((num_slices, LANES), jnp.float32),
        grid_spec=pltpu.PrefetchScalarGridSpec(
            num_scalar_prefetch=0,
            grid=(num_slices, bps),
            in_specs=[
                pl.BlockSpec((row_tile, LANES), in_map),
                pl.BlockSpec((row_tile, LANES), in_map),
            ],
            out_specs=pl.BlockSpec((1, LANES), lambda c, i: (c, 0)),
            scratch_shapes=[pltpu.VMEM((SUBLANES, LANES), jnp.float32)],
        ),
        compiler_params=pltpu.CompilerParams(
            dimension_semantics=("parallel", "arbitrary"),
        ),
    )(p2d, t2d)

    # Tiny final combine (num_slices x 128 values) + divide by the true element count.
    return jnp.sum(partials) / jnp.float32(total)


def _reference(pred, true, alpha=ALPHA):
    x = pred.astype(jnp.float32)
    y = true.astype(jnp.float32)
    loss = jnp.maximum(x, 0.0) - x * y + jnp.log1p(jnp.exp(-jnp.abs(x)))
    p = jax.nn.sigmoid(x)
    dx = p - y
    af = 1.0 - jnp.exp((dx - 1.0) / (alpha + 1e-4))
    return jnp.mean(loss * af)


if __name__ == "__main__":
    key = jax.random.PRNGKey(0)
    k1, k2, k3, k4 = jax.random.split(key, 4)

    # NCHW, like the PyTorch module's typical inputs.
    pred = jax.random.normal(k1, (2, 4, 16, 16), dtype=jnp.float32)
    true = (jax.random.uniform(k2, (2, 4, 16, 16)) > 0.5).astype(jnp.float32)

    out = jax.block_until_ready(bce_blur_with_logits_loss(pred, true))
    ref = _reference(pred, true)
    assert jnp.allclose(out, ref, atol=1e-5, rtol=1e-5), (out, ref)

    # Non-8*128-divisible shape exercises the in-kernel mask path.
    pred_r = jax.random.normal(k3, (2, 3, 13, 13), dtype=jnp.float32)
    true_r = (jax.random.uniform(k4, (2, 3, 13, 13)) > 0.5).astype(jnp.float32)
    out_r = jax.block_until_ready(bce_blur_with_logits_loss(pred_r, true_r))
    ref_r = _reference(pred_r, true_r)
    assert jnp.allclose(out_r, ref_r, atol=1e-5, rtol=1e-5), (out_r, ref_r)

    print("KERNEL_OK")
</pallas_src>

<mosaic_0001>
module attributes {stable_mosaic.version = 11 : i64} {
  func.func @_bce_blur_kernel(%arg0: i32, %arg1: i32, %arg2: memref<16x128xf32, #tpu.memory_space<vmem>>, %arg3: memref<16x128xf32, #tpu.memory_space<vmem>>, %arg4: memref<1x128xf32, #tpu.memory_space<vmem>>, %arg5: memref<8x128xf32, #tpu.memory_space<vmem>>) attributes {dimension_semantics = [#tpu.dimension_semantics<parallel>, #tpu.dimension_semantics<arbitrary>], iteration_bounds = array<i64: 1, 1>, scalar_prefetch = 0 : i64, scratch_operands = 1 : i64, tpu.core_type = #tpu.core_type<tc>, window_params = [{transform_indices = @transform_0, window_bounds = array<i64: 16, 128>}, {transform_indices = @transform_1, window_bounds = array<i64: 16, 128>}, {transform_indices = @transform_2, window_bounds = array<i64: 1, 128>}]} {
    %c0_i32 = arith.constant 0 : i32
    %0 = arith.cmpi eq, %arg1, %c0_i32 : i32
    %1 = arith.extui %0 : i1 to i32
    %c0_i32_0 = arith.constant 0 : i32
    %2 = arith.cmpi ne, %1, %c0_i32_0 : i32
    scf.if %2 {
      %cst_18 = arith.constant 0.000000e+00 : f32
      %40 = vector.broadcast %cst_18 : f32 to vector<8x128xf32>
      %c0_19 = arith.constant 0 : index
      %c0_20 = arith.constant 0 : index
      %41 = vector.load %arg5[%c0_19, %c0_20] : memref<8x128xf32, #tpu.memory_space<vmem>>, vector<8x128xf32>
      tpu.vector_store %arg5[%c0_19, %c0_20], %40 {strides = array<i32>} : memref<8x128xf32, #tpu.memory_space<vmem>>, vector<8x128xf32>,
    } else {
    }
    %c0 = arith.constant 0 : index
    %c0_1 = arith.constant 0 : index
    %3 = vector.load %arg2[%c0, %c0_1] : memref<16x128xf32, #tpu.memory_space<vmem>>, vector<16x128xf32>
    %c0_2 = arith.constant 0 : index
    %c0_3 = arith.constant 0 : index
    %4 = vector.load %arg3[%c0_2, %c0_3] : memref<16x128xf32, #tpu.memory_space<vmem>>, vector<16x128xf32>
    %5 = math.absf %3 : vector<16x128xf32>
    %cst = arith.constant 0.000000e+00 : f32
    %6 = vector.broadcast %cst : f32 to vector<16x128xf32>
    %7 = arith.subf %6, %5 : vector<16x128xf32>
    %8 = math.exp %7 : vector<16x128xf32>
    %cst_4 = arith.constant 0.000000e+00 : f32
    %9 = vector.broadcast %cst_4 : f32 to vector<16x128xf32>
    %10 = arith.maximumf %3, %9 : vector<16x128xf32>
    %11 = arith.mulf %3, %4 : vector<16x128xf32>
    %12 = arith.subf %10, %11 : vector<16x128xf32>
    %13 = math.log1p %8 : vector<16x128xf32>
    %14 = arith.addf %12, %13 : vector<16x128xf32>
    %cst_5 = arith.constant 1.000000e+00 : f32
    %15 = vector.broadcast %cst_5 : f32 to vector<16x128xf32>
    %16 = arith.addf %15, %8 : vector<16x128xf32>
    %cst_6 = arith.constant 1.000000e+00 : f32
    %17 = vector.broadcast %cst_6 : f32 to vector<16x128xf32>
    %18 = arith.divf %17, %16 : vector<16x128xf32>
    %cst_7 = arith.constant 0.000000e+00 : f32
    %19 = vector.broadcast %cst_7 : f32 to vector<16x128xf32>
    %20 = arith.cmpf oge, %3, %19 : vector<16x128xf32>
    %21 = arith.mulf %8, %18 : vector<16x128xf32>
    %22 = arith.select %20, %18, %21 : vector<16x128xi1>, vector<16x128xf32>
    %23 = arith.subf %22, %4 : vector<16x128xf32>
    %cst_8 = arith.constant 1.000000e+00 : f32
    %24 = vector.broadcast %cst_8 : f32 to vector<16x128xf32>
    %25 = arith.subf %23, %24 : vector<16x128xf32>
    %cst_9 = arith.constant 5.010000e-02 : f32
    %26 = vector.broadcast %cst_9 : f32 to vector<16x128xf32>
    %27 = arith.divf %25, %26 : vector<16x128xf32>
    %28 = math.exp %27 : vector<16x128xf32>
    %cst_10 = arith.constant 1.000000e+00 : f32
    %29 = vector.broadcast %cst_10 : f32 to vector<16x128xf32>
    %30 = arith.subf %29, %28 : vector<16x128xf32>
    %31 = arith.mulf %14, %30 : vector<16x128xf32>
    %c0_11 = arith.constant 0 : index
    %c0_12 = arith.constant 0 : index
    %32 = vector.load %arg5[%c0_11, %c0_12] : memref<8x128xf32, #tpu.memory_space<vmem>>, vector<8x128xf32>
    %33 = vector.shape_cast %31 : vector<16x128xf32> to vector<2x8x128xf32>
    %cst_13 = arith.constant dense<0.000000e+00> : vector<8x128xf32>
    %34 = vector.multi_reduction <add>, %33, %cst_13 [0] : vector<2x8x128xf32> to vector<8x128xf32>
    %35 = arith.addf %32, %34 : vector<8x128xf32>
    %c0_14 = arith.constant 0 : index
    %c0_15 = arith.constant 0 : index
    %36 = vector.load %arg5[%c0_14, %c0_15] : memref<8x128xf32, #tpu.memory_space<vmem>>, vector<8x128xf32>
    tpu.vector_store %arg5[%c0_14, %c0_15], %35 {strides = array<i32>} : memref<8x128xf32, #tpu.memory_space<vmem>>, vector<8x128xf32>,
    %c0_i32_16 = arith.constant 0 : i32
    %37 = arith.cmpi eq, %arg1, %c0_i32_16 : i32
    %38 = arith.extui %37 : i1 to i32
    %c0_i32_17 = arith.constant 0 : i32
    %39 = arith.cmpi ne, %38, %c0_i32_17 : i32
    scf.if %39 {
      %c0_18 = arith.constant 0 : index
      %c0_19 = arith.constant 0 : index
      %40 = vector.load %arg5[%c0_18, %c0_19] : memref<8x128xf32, #tpu.memory_space<vmem>>, vector<8x128xf32>
      %cst_20 = arith.constant dense<0.000000e+00> : vector<128xf32>
      %41 = vector.multi_reduction <add>, %40, %cst_20 [0] : vector<8x128xf32> to vector<128xf32>
      %42 = vector.shape_cast %41 : vector<128xf32> to vector<1x128xf32>
      %c0_21 = arith.constant 0 : index
      %c0_22 = arith.constant 0 : index
      %43 = vector.load %arg4[%c0_21, %c0_22] : memref<1x128xf32, #tpu.memory_space<vmem>>, vector<1x128xf32>
      tpu.vector_store %arg4[%c0_21, %c0_22], %42 {strides = array<i32>} : memref<1x128xf32, #tpu.memory_space<vmem>>, vector<1x128xf32>,
    } else {
    }
    return
  }
  func.func @transform_0(%arg0: i32, %arg1: i32) -> (i32, i32) {
    %c1_i32 = arith.constant 1 : i32
    %0 = arith.muli %arg0, %c1_i32 : i32
    %1 = arith.addi %0, %arg1 : i32
    %c0_i32 = arith.constant 0 : i32
    %2 = arith.minsi %1, %c0_i32 : i32
    %c0_i32_0 = arith.constant 0 : i32
    %c0_i32_1 = arith.constant 0 : i32
    return %2, %c0_i32_0 : i32, i32
  }
  func.func @transform_1(%arg0: i32, %arg1: i32) -> (i32, i32) {
    %c1_i32 = arith.constant 1 : i32
    %0 = arith.muli %arg0, %c1_i32 : i32
    %1 = arith.addi %0, %arg1 : i32
    %c0_i32 = arith.constant 0 : i32
    %2 = arith.minsi %1, %c0_i32 : i32
    %c0_i32_0 = arith.constant 0 : i32
    %c0_i32_1 = arith.constant 0 : i32
    return %2, %c0_i32_0 : i32, i32
  }
  func.func @transform_2(%arg0: i32, %arg1: i32) -> (i32, i32) {
    %c0_i32 = arith.constant 0 : i32
    %c0_i32_0 = arith.constant 0 : i32
    return %arg0, %c0_i32 : i32, i32
  }
}

</mosaic_0001>

<bundles_post_ra>
// kernel: tpu_custom_call.1
= control target key start
LH: loop header
LB: loop body
LE: loop exit
PB: predicated region body
PF: predicated region fallthrough
CT: control target
= control target key end

     0   :  { %7 = vsyncpa [#allocation4], 0  ;;  %s316_s0 = inlined_call_operand.hbm [shape: f32[16,128], index: 0, kind: input, shape index: {}]   ;;  %s317_s1 = inlined_call_operand.hbm [shape: f32[16,128], index: 1, kind: input, shape index: {}]   ;;  %s318_s2 = inlined_call_operand.hbm [shape: f32[1,128], index: 2, kind: output, shape index: {}]  }
   0x1   :  { %8 = vsyncpa [#allocation7], 0 }
   0x2   :  { %9 = vsyncpa [#allocation5], 0  ;;  %s260_s9 = smov [#allocation3]   ;;  %s188_s13 = scalar_lea.hbm %s316_s0, 256 }
   0x3   :  { %s21_s10 = sshll.u32 %s260_s9, 4  ;;  %p189_p0 = scmp.ne.s32.totalorder %s316_s0, %s188_s13  ;;  %s22_s10 = int_to_ptr.vmem [resolvable:$true] %s21_s10 }
   0x4   :  { %p192_p1 = scmp.lt.u32.totalorder %s188_s13, %s316_s0 }
   0x6   :  { %p194_p2 = pnand %p192_p1, %p189_p0 }
   0x8   :  { %197 = shalt.err (!%p194_p2)
}
   0x9   :  { %s198_s18 = scalar_lea.vmem %s22_s10, 256  ;;  %p203_p4 = scmp.lt.s32.totalorder %s22_s10, %s22_s10 }
   0xa   :  { %p199_p3 = scmp.ne.s32.totalorder %s22_s10, %s198_s18  ;;  %p204_p5 = scmp.lt.s32.totalorder %s198_s18, %s198_s18 }
   0xc   :  { %p205_p6 = por %p204_p5, %p203_p4 }
   0xe   :  { %p206_p7 = pnand %p205_p6, %p199_p3 }
  0x10   :  { %209 = shalt.err (!%p206_p7)
}
  0x11   :  { %s261_s19 = smov 128   ;;  %s262_s20 = smov 8  }
  0x12   :  { %27 = dma.hbm_to_vmem [thread:$0]  %s316_s0, 256, %s22_s10, [#allocation4], %s261_s19, %s261_s19, %s262_s20  }
  0x13   :  { %s263_s23 = smov [#allocation6]   ;;  %s210_s27 = scalar_lea.hbm %s317_s1, 256 }
  0x14   :  { %s39_s24 = sshll.u32 %s263_s23, 4  ;;  %p211_p8 = scmp.ne.s32.totalorder %s317_s1, %s210_s27  ;;  %s40_s24 = int_to_ptr.vmem [resolvable:$true] %s39_s24 }
  0x15   :  { %p214_p9 = scmp.lt.u32.totalorder %s210_s27, %s317_s1 }
  0x17   :  { %p216_p10 = pnand %p214_p9, %p211_p8 }
  0x19   :  { %219 = shalt.err (!%p216_p10)
}
  0x1a   :  { %s220_s4 = scalar_lea.vmem %s40_s24, 256  ;;  %p225_p12 = scmp.lt.s32.totalorder %s40_s24, %s40_s24 }
  0x1b   :  { %p221_p11 = scmp.ne.s32.totalorder %s40_s24, %s220_s4  ;;  %p226_p13 = scmp.lt.s32.totalorder %s220_s4, %s220_s4 }
  0x1d   :  { %p227_p0 = por %p226_p13, %p225_p12 }
  0x1f   :  { %p228_p1 = pnand %p227_p0, %p221_p11 }
  0x21   :  { %231 = shalt.err (!%p228_p1)
}
  0x22   :  { %45 = dma.hbm_to_vmem [thread:$0]  %s317_s1, 256, %s40_s24, [#allocation7], %s261_s19, %s261_s19, %s262_s20  }
  0x23   :  { %254 = dma.done.wait [#allocation4], 256  }
  0x24   :  { %255 = vsyncadd [#allocation4], 4294967040 }
  0x25   :  { %256 = dma.done.wait [#allocation7], 256  }
  0x26   :  { %257 = vsyncadd [#allocation7], 4294967040  ;;  %v65_v0 = vld [vmem:[#allocation3] sm:$0xff]  ;;  %v66_v1 = vld [vmem:[#allocation3 + $0x8] sm:$0xff]  ;;  %s264_s1 = smov [#allocation8]  }
  0x27   :  { %v69_v2 = vand.u32 2147483647, %v65_v0  ;;  %v70_v3 = vand.u32 2147483647, %v66_v1  ;;  %vm109_vm0 = vcmp.ge.f32.partialorder %v65_v0, 0.0  ;;  %v67_v14 = vld [vmem:[#allocation6] sm:$0xff] }
  0x28   :  { %vm110_vm1 = vcmp.ge.f32.partialorder %v66_v1, 0.0  ;;  %v68_v16 = vld [vmem:[#allocation6 + $0x8] sm:$0xff]  ;;  %v77_v36 = vmax.f32 %v65_v0, 0.0  ;;  %v79_v37 = vmul.f32 %v67_v14, %v65_v0  ;;  %v78_v38 = vmax.f32 %v66_v1, 0.0  ;;  %s151_s6 = sshll.u32 %s264_s1, 4  ;;  %s152_s6 = int_to_ptr.vmem [resolvable:$true] %s151_s6 }
  0x29   :  { %v71_v4 = vsub.f32 0.0, %v69_v2  ;;  %v72_v5 = vsub.f32 0.0, %v70_v3  ;;  %v80_v39 = vmul.f32 %v68_v16, %v66_v1  ;;  %s232_s7 = scalar_lea.vmem %s152_s6, 16  ;;  %s236_s8 = scalar_lea.vmem %s152_s6, 32 }
  0x2a   :  { %v81_v44 = vsub.f32 %v77_v36, %v79_v37  ;;  %p233_p2 = scmp.ne.s32.totalorder %s152_s6, %s232_s7  ;;  %p237_p3 = scmp.lt.s32.totalorder %s152_s6, %s152_s6 }
  0x2b   :  { %v73_v6 = vmul.f32 1.442695, %v71_v4  ;;  %v75_v7 = vmul.f32 1.442695, %v72_v5  ;;  %v82_v45 = vsub.f32 %v78_v38, %v80_v39  ;;  %p238_p4 = scmp.lt.s32.totalorder %s236_s8, %s232_s7 }
  0x2d   :  { %172 = vpow2.f32 %v73_v6  ;;  %p239_p5 = por %p238_p4, %p237_p3 }
  0x2e   :  { %174 = vpow2.f32 %v75_v7 }
  0x2f   :  { %p240_p6 = pnand %p239_p5, %p233_p2 }
  0x37   :  { %v173_v8 = vpop.eup %172 }
  0x38   :  { %v175_v9 = vpop.eup %174  ;;  %v83_v10 = vadd.f32 1.0, %v173_v8  ;;  %v86_v22 = vmul.f32 -0.5, %v173_v8  ;;  %v89_v31 = vand.u32 2147483647, %v173_v8 }
  0x39   :  { %v92_v11 = vadd.f32 1.0, %v175_v9  ;;  %v95_v24 = vmul.f32 -0.5, %v175_v9  ;;  %v98_v35 = vand.u32 2147483647, %v175_v9 }
  0x3a   :  { %176 = vrcp.f32 %v83_v10  ;;  %v87_v28 = vadd.f32 1.0, %v86_v22  ;;  %vm90_vm2 = vcmp.lt.f32.partialorder %v89_v31, 0.0004427343 }
  0x3b   :  { %178 = vrcp.f32 %v92_v11  ;;  %v96_v32 = vadd.f32 1.0, %v95_v24  ;;  %vm99_vm3 = vcmp.lt.f32.partialorder %v98_v35, 0.0004427343 }
  0x3c   :  { %180 = vlog2.f32 %v83_v10  ;;  %v88_v41 = vmul.f32 %v173_v8, %v87_v28 }
  0x3d   :  { %182 = vlog2.f32 %v92_v11  ;;  %v97_v43 = vmul.f32 %v175_v9, %v96_v32 }
  0x44   :  { %v177_v12 = vpop.eup %176 }
  0x45   :  { %v179_v13 = vpop.eup %178  ;;  %v111_v15 = vmul.f32 %v177_v12, %v173_v8 }
  0x46   :  { %v112_v17 = vmul.f32 %v179_v13, %v175_v9  ;;  %v181_v30 = vpop.eup %180 }
  0x47   :  { %v113_v18 = vsel %vm109_vm0, %v177_v12, %v111_v15  ;;  %v183_v34 = vpop.eup %182  ;;  %v85_v40 = vmul.f32 0.6931472, %v181_v30 }
  0x48   :  { %v114_v19 = vsel %vm110_vm1, %v179_v13, %v112_v17  ;;  %v115_v20 = vsub.f32 %v113_v18, %v67_v14  ;;  %v94_v42 = vmul.f32 0.6931472, %v183_v34 }
  0x49   :  { %v116_v21 = vsub.f32 %v114_v19, %v68_v16  ;;  %v91_v46 = vsel %vm90_vm2, %v88_v41, %v85_v40 }
  0x4a   :  { %v165_v23 = vadd.f32 -1.0, %v115_v20  ;;  %v100_v47 = vsel %vm99_vm3, %v97_v43, %v94_v42  ;;  %v101_v48 = vadd.f32 %v91_v46, %v81_v44 }
  0x4b   :  { %v166_v25 = vadd.f32 -1.0, %v116_v21  ;;  %v102_v50 = vadd.f32 %v100_v47, %v82_v45 }
  0x4c   :  { %v120_v26 = vmul.f32 19.960081, %v165_v23 }
  0x4d   :  { %v121_v27 = vmul.f32 19.960081, %v166_v25 }
  0x4e   :  { %v122_v29 = vmul.f32 1.442695, %v120_v26 }
  0x4f   :  { %v124_v33 = vmul.f32 1.442695, %v121_v27 }
  0x50   :  { %184 = vpow2.f32 %v122_v29 }
  0x51   :  { %186 = vpow2.f32 %v124_v33 }
  0x5a   :  { %v185_v49 = vpop.eup %184 }
  0x5b   :  { %v187_v51 = vpop.eup %186  ;;  %v126_v52 = vsub.f32 1.0, %v185_v49 }
  0x5c   :  { %v127_v53 = vsub.f32 1.0, %v187_v51 }
  0x5d   :  { %v128_v54 = vmul.f32 %v126_v52, %v101_v48 }
  0x5e   :  { %v129_v55 = vmul.f32 %v127_v53, %v102_v50 }
  0x60   :  { %v131_v56 = vadd.f32 %v129_v55, %v128_v54 }
  0x62   :  { %v138_v57 = vrot.slane %v131_v56, 4 }
  0x64   :  { %v139_v58 = vadd.f32 %v138_v57, %v131_v56 }
  0x66   :  { %v140_v59 = vrot.slane %v139_v58, 2 }
  0x68   :  { %v141_v60 = vadd.f32 %v140_v59, %v139_v58 }
  0x6a   :  { %v142_v61 = vrot.slane %v141_v60, 1 }
  0x6c   :  { %v143_v62 = vadd.f32 %v142_v61, %v141_v60 }
  0x6e   :  { %144 = vst [vmem:[#allocation8] sm:$0x1] %v143_v62 }
  0x6f   :  { %243 = shalt.err (!%p240_p6)
}
  0x70   :  { %s244_s11 = scalar_lea.hbm %s318_s2, 16 }
  0x71   :  { %p245_p7 = scmp.ne.s32.totalorder %s318_s2, %s244_s11  ;;  %p248_p8 = scmp.lt.u32.totalorder %s244_s11, %s318_s2 }
  0x73   :  { %p250_p9 = pnand %p248_p8, %p245_p7 }
  0x75   :  { %253 = shalt.err (!%p250_p9)
}
  0x76   :  { %154 = dma.vmem_to_hbm [thread:$0]  %s152_s6, 16, %s318_s2, [#allocation5]  }
  0x77   :  { %258 = dma.done.wait [#allocation5], 16  }
  0x78   :  { %259 = vsyncadd [#allocation5], 4294967280 }
  0x79   :  { %158 = vsyncpa [#allocation4], 1 }
  0x7a   :  { %159 = vsyncpa [#allocation7], 1 }
  0x7b   :  { %160 = vsyncpa [#allocation5], 1 }

</bundles_post_ra>
